<compile_context>
chip_gen: v7x
topology: tpu7x:2x2x1
jax: 0.10.0
libtpu: 0.0.40
codegen_flags: <defaults>
</compile_context>

<pallas_src>
import functools

import jax
import jax.numpy as jnp
from jax import lax
from jax.experimental import pallas as pl
from jax.experimental.pallas import tpu as pltpu


def _round_up(x, m):
    return ((x + m - 1) // m) * m


def _largest_divisor_tile(total, cap, quantum=8):
    """Largest multiple of `quantum` that divides `total` and is <= cap."""
    units = total // quantum
    best = 1
    for d in range(1, max(1, min(cap // quantum, units)) + 1):
        if units % d == 0:
            best = d
    return best * quantum


# ---------------------------------------------------------------------------
# Kernel 1: pairwise squared distances (optionally fused with exp(-gamma * d)).
# Grid: (N tiles, M tiles, K tiles); K is the innermost reduction axis.
# Do NOT reorder the grid: the output block is resident across K.
# ---------------------------------------------------------------------------
def _dnorm2_kernel(gamma_ref, x_ref, y_ref, x2_ref, y2t_ref, o_ref, *, fuse_exp):
    k = pl.program_id(2)

    @pl.when(k == 0)
    def _():
        o_ref[...] = jnp.zeros_like(o_ref)

    # Cross term only.  Contraction on the last dim of both operands maps
    # straight onto the MXU's native LHS @ RHS^T form (no transpose ever
    # materialized); accumulate directly into the resident f32 output block.
    o_ref[...] += lax.dot_general(
        x_ref[...], y_ref[...],
        dimension_numbers=(((1,), (1,)), ((), ())),
        preferred_element_type=jnp.float32,
    )

    @pl.when(k == pl.num_programs(2) - 1)
    def _():
        # Epilogue: one broadcast add per output tile (norms precomputed).
        d = x2_ref[...] + y2t_ref[...] - 2.0 * o_ref[...]
        if fuse_exp:
            d = jnp.exp(-gamma_ref[0] * d)
        o_ref[...] = d


def _dnorm2_padded(X, Y, gamma_arr, *, fuse_exp, use_bf16=False):
    """Padded (Np, Mp) dnorm2 (or exp(-gamma*dnorm2) if fuse_exp)."""
    N, D = X.shape
    M, Dy = Y.shape
    assert D == Dy, "feature dims must match"

    q = 16 if use_bf16 else 8              # sublane quantum for operand tiles
    tn = min(_round_up(N, q), 256)
    tm = min(_round_up(M, 128), 512)
    tk = min(_round_up(D, 128), 512)

    # v7x has 2 TensorCores: make sure there are >= 2 blocks along a parallel
    # grid axis whenever the problem allows it.
    if (_round_up(N, tn) // tn) * (_round_up(M, tm) // tm) < 2:
        if M > 128:
            tm = _round_up(-(-M // 2), 128)
        elif N > q:
            tn = _round_up(-(-N // 2), q)

    Np, Mp, Dp = _round_up(N, tn), _round_up(M, tm), _round_up(D, tk)

    Xp = jnp.pad(X.astype(jnp.float32), ((0, Np - N), (0, Dp - D)))
    Yp = jnp.pad(Y.astype(jnp.float32), ((0, Mp - M), (0, Dp - D)))

    # Row norms precomputed once, in f32 (zero pad columns contribute nothing).
    x2 = jnp.sum(Xp * Xp, axis=1, keepdims=True)       # (Np, 1)
    y2t = jnp.sum(Yp * Yp, axis=1)[None, :]            # (1, Mp)

    if use_bf16:
        # bf16 operands: native MXU dtype on all generations; halves DMA/VMEM
        # for X/Y.  Norms and the -2*acc epilogue stay f32.
        Xp = Xp.astype(jnp.bfloat16)
        Yp = Yp.astype(jnp.bfloat16)

    nbytes = 2 if use_bf16 else 4
    cost = pl.CostEstimate(
        flops=2 * Np * Mp * Dp + 3 * Np * Mp,
        transcendentals=(Np * Mp) if fuse_exp else 0,
        bytes_accessed=nbytes * (Np * Dp + Mp * Dp) + 4 * (Np * Mp + Np + Mp),
    )

    return pl.pallas_call(
        functools.partial(_dnorm2_kernel, fuse_exp=fuse_exp),
        out_shape=jax.ShapeDtypeStruct((Np, Mp), jnp.float32),
        grid_spec=pltpu.PrefetchScalarGridSpec(
            num_scalar_prefetch=0,
            grid=(Np // tn, Mp // tm, Dp // tk),
            in_specs=[
                pl.BlockSpec(memory_space=pltpu.MemorySpace.SMEM),    # gamma
                pl.BlockSpec((tn, tk), lambda i, j, k: (i, k)),       # X tile
                pl.BlockSpec((tm, tk), lambda i, j, k: (j, k)),       # Y tile
                pl.BlockSpec((tn, 1), lambda i, j, k: (i, 0)),        # ||x||^2
                pl.BlockSpec((1, tm), lambda i, j, k: (0, j)),        # ||y||^2
            ],
            out_specs=pl.BlockSpec((tn, tm), lambda i, j, k: (i, j)),
        ),
        compiler_params=pltpu.CompilerParams(
            dimension_semantics=("parallel", "parallel", "arbitrary"),
            vmem_limit_bytes=32 * 1024 * 1024,   # explicit, generation-safe budget
        ),
        cost_estimate=cost,
    )(gamma_arr, Xp, Yp, x2, y2t)


# ---------------------------------------------------------------------------
# Kernel 2: tiled elementwise K = exp(-gamma * dnorm2), gamma via SMEM scalar.
# Only used on the median-bandwidth path (gamma is a traced value there).
# Input stays padded (lane-dense stores); output aliases the input buffer.
# ---------------------------------------------------------------------------
def _rbf_exp_kernel(d_ref, gamma_ref, o_ref):
    o_ref[...] = jnp.exp(-gamma_ref[0] * d_ref[...])


def rbf_exp_padded(d_padded, gamma):
    Np, Mp = d_padded.shape
    # Row blocks capped at ~2 MiB: input + output double-buffered stays well
    # under v5e's 16 MiB scoped-VMEM default (the previous 4 MiB cap sat
    # exactly at the limit).  Block rows must divide Np (already 8-aligned).
    lane_bytes = 4 * Mp
    cap_rows = max(8, (((2 << 20) // lane_bytes) // 8) * 8)
    tn = _largest_divisor_tile(Np, cap=min(cap_rows, Np), quantum=8)

    gamma_arr = jnp.asarray(gamma, jnp.float32).reshape((1,))
    return pl.pallas_call(
        _rbf_exp_kernel,
        out_shape=jax.ShapeDtypeStruct((Np, Mp), jnp.float32),
        grid_spec=pltpu.PrefetchScalarGridSpec(
            num_scalar_prefetch=0,
            grid=(Np // tn,),
            in_specs=[
                pl.BlockSpec((tn, Mp), lambda i: (i, 0)),
                pl.BlockSpec(memory_space=pltpu.MemorySpace.SMEM),    # gamma
            ],
            out_specs=pl.BlockSpec((tn, Mp), lambda i: (i, 0)),
        ),
        input_output_aliases={0: 0},     # dnorm2 is dead after the exp
        compiler_params=pltpu.CompilerParams(
            dimension_semantics=("parallel",),
            vmem_limit_bytes=16 * 1024 * 1024,
        ),
        cost_estimate=pl.CostEstimate(
            flops=Np * Mp, transcendentals=Np * Mp,
            bytes_accessed=2 * 4 * Np * Mp,
        ),
    )(d_padded, gamma_arr)


# ---------------------------------------------------------------------------
# Full RBF forward (matches the PyTorch module).
# ---------------------------------------------------------------------------
@functools.partial(jax.jit, static_argnames=("use_bf16",))
def _rbf_fixed_jit(X, Y, sigma, use_bf16=False):
    # sigma is a runtime value -> annealing the bandwidth does not retrace.
    N, M = X.shape[0], Y.shape[0]
    gamma = 1.0 / (1e-8 + 2.0 * sigma * sigma)
    gamma_arr = jnp.asarray(gamma, jnp.float32).reshape((1,))
    out_p = _dnorm2_padded(X, Y, gamma_arr, fuse_exp=True, use_bf16=use_bf16)
    return out_p[:N, :M]


@functools.partial(jax.jit, static_argnames=("use_bf16",))
def _rbf_median_jit(X, Y, use_bf16=False):
    N, M = X.shape[0], Y.shape[0]
    dummy_gamma = jnp.zeros((1,), jnp.float32)
    d_p = _dnorm2_padded(X, Y, dummy_gamma, fuse_exp=False, use_bf16=use_bf16)
    # Exact median over the valid (N, M) region (matches np.median in the
    # PyTorch reference); N*M (particle count squared) is small in SVGD.
    med = jnp.median(d_p[:N, :M])
    h = med / (2.0 * jnp.log(N + 1.0))
    sigma = jnp.sqrt(h)
    gamma = 1.0 / (1e-8 + 2.0 * sigma * sigma)
    K_p = rbf_exp_padded(d_p, gamma)      # padded -> lane-dense stores
    return K_p[:N, :M]


def rbf_forward(X, Y, sigma=None, use_bf16=False):
    if sigma is None:
        return _rbf_median_jit(X, Y, use_bf16=use_bf16)
    return _rbf_fixed_jit(X, Y, jnp.asarray(sigma, jnp.float32), use_bf16=use_bf16)


def rbf_reference(X, Y, sigma=None):
    """Plain-JAX reference mirroring the PyTorch forward."""
    XX = X @ X.T
    XY = X @ Y.T
    YY = Y @ Y.T
    dnorm2 = -2.0 * XY + jnp.diag(XX)[:, None] + jnp.diag(YY)[None, :]
    if sigma is None:
        h = jnp.median(dnorm2) / (2.0 * jnp.log(X.shape[0] + 1.0))
        sigma = jnp.sqrt(h)
    gamma = 1.0 / (1e-8 + 2.0 * sigma ** 2)
    return jnp.exp(-gamma * dnorm2)


if __name__ == "__main__":
    key = jax.random.PRNGKey(0)

    # ---- SVGD-scale test: N particles, flattened D-dim parameter vectors ----
    N, D = 8, 256
    kx, ky, kz = jax.random.split(key, 3)
    X = jax.random.normal(kx, (N, D), dtype=jnp.float32)
    Y = jax.random.normal(ky, (N, D), dtype=jnp.float32)

    # sigma=None path (median heuristic) — the default module behavior.
    K = jax.block_until_ready(rbf_forward(X, Y, sigma=None))
    K_ref = rbf_reference(X, Y, sigma=None)
    assert K.shape == (N, N)
    assert jnp.allclose(K, K_ref, atol=1e-5, rtol=1e-5), "mismatch (median sigma)"

    # Fixed-sigma path (exp fused into the matmul epilogue, gamma via SMEM).
    K2 = jax.block_until_ready(rbf_forward(X, Y, sigma=1.5))
    K2_ref = rbf_reference(X, Y, sigma=1.5)
    assert jnp.allclose(K2, K2_ref, atol=1e-5, rtol=1e-5), "mismatch (fixed sigma)"

    # Changing sigma must NOT retrace (runtime SMEM scalar).
    K2b = jax.block_until_ready(rbf_forward(X, Y, sigma=0.9))
    K2b_ref = rbf_reference(X, Y, sigma=0.9)
    assert jnp.allclose(K2b, K2b_ref, atol=1e-5, rtol=1e-5), "mismatch (fixed sigma 2)"

    # ---- Non-aligned shapes exercise padding / tiling / v7x split paths ----
    N2, M2, D2 = 40, 24, 300
    ka, kb = jax.random.split(kz)
    X2 = jax.random.normal(ka, (N2, D2), dtype=jnp.float32)
    Y2 = jax.random.normal(kb, (M2, D2), dtype=jnp.float32)

    K3 = jax.block_until_ready(rbf_forward(X2, Y2, sigma=0.7))
    K3_ref = rbf_reference(X2, Y2, sigma=0.7)
    assert K3.shape == (N2, M2)
    assert jnp.allclose(K3, K3_ref, atol=1e-5, rtol=1e-5), "mismatch (non-aligned, fixed)"

    K4 = jax.block_until_ready(rbf_forward(X2, Y2, sigma=None))
    K4_ref = rbf_reference(X2, Y2, sigma=None)
    assert jnp.allclose(K4, K4_ref, atol=1e-5, rtol=1e-5), "mismatch (non-aligned, median)"

    # ---- Optional bf16-operand MXU path (norms/epilogue stay f32) ----
    K5 = jax.block_until_ready(rbf_forward(X, Y, sigma=None, use_bf16=True))
    assert jnp.all(jnp.isfinite(K5))
    assert jnp.allclose(K5, K_ref, atol=1e-2), "mismatch (bf16 operands)"

    print("KERNEL_OK")
</pallas_src>

<mosaic_0001>
module attributes {stable_mosaic.version = 11 : i64} {
  func.func @_dnorm2_kernel(%arg0: i32, %arg1: i32, %arg2: i32, %arg3: memref<1xf32, #tpu.memory_space<smem>>, %arg4: memref<8x256xf32, #tpu.memory_space<vmem>>, %arg5: memref<128x256xf32, #tpu.memory_space<vmem>>, %arg6: memref<8x1xf32, #tpu.memory_space<vmem>>, %arg7: memref<1x128xf32, #tpu.memory_space<vmem>>, %arg8: memref<8x128xf32, #tpu.memory_space<vmem>>) attributes {dimension_semantics = [#tpu.dimension_semantics<parallel>, #tpu.dimension_semantics<parallel>, #tpu.dimension_semantics<arbitrary>], iteration_bounds = array<i64: 1, 1, 1>, scalar_prefetch = 0 : i64, scratch_operands = 0 : i64, tpu.core_type = #tpu.core_type<tc>, window_params = [{transform_indices = @transform_0, window_bounds = array<i64: 1>}, {transform_indices = @transform_1, window_bounds = array<i64: 8, 256>}, {transform_indices = @transform_2, window_bounds = array<i64: 128, 256>}, {transform_indices = @transform_3, window_bounds = array<i64: 8, 1>}, {transform_indices = @transform_4, window_bounds = array<i64: 1, 128>}, {transform_indices = @transform_5, window_bounds = array<i64: 8, 128>}]} {
    %c0_i32 = arith.constant 0 : i32
    %0 = arith.cmpi eq, %arg2, %c0_i32 : i32
    %1 = arith.extui %0 : i1 to i32
    %c0_i32_0 = arith.constant 0 : i32
    %2 = arith.cmpi ne, %1, %c0_i32_0 : i32
    scf.if %2 {
      %cst_10 = arith.constant 0.000000e+00 : f32
      %12 = vector.broadcast %cst_10 : f32 to vector<8x128xf32>
      %c0_11 = arith.constant 0 : index
      %c0_12 = arith.constant 0 : index
      %13 = vector.load %arg8[%c0_11, %c0_12] : memref<8x128xf32, #tpu.memory_space<vmem>>, vector<8x128xf32>
      tpu.vector_store %arg8[%c0_11, %c0_12], %12 {strides = array<i32>} : memref<8x128xf32, #tpu.memory_space<vmem>>, vector<8x128xf32>,
    } else {
    }
    %c0 = arith.constant 0 : index
    %c0_1 = arith.constant 0 : index
    %3 = vector.load %arg8[%c0, %c0_1] : memref<8x128xf32, #tpu.memory_space<vmem>>, vector<8x128xf32>
    %c0_2 = arith.constant 0 : index
    %c0_3 = arith.constant 0 : index
    %4 = vector.load %arg4[%c0_2, %c0_3] : memref<8x256xf32, #tpu.memory_space<vmem>>, vector<8x256xf32>
    %c0_4 = arith.constant 0 : index
    %c0_5 = arith.constant 0 : index
    %5 = vector.load %arg5[%c0_4, %c0_5] : memref<128x256xf32, #tpu.memory_space<vmem>>, vector<128x256xf32>
    %cst = arith.constant dense<0.000000e+00> : vector<8x128xf32>
    %6 = tpu.matmul %4, %5, %cst {dimension_numbers = #tpu.dot_dimension_numbers<[1], [1], [0], [0], [0, 0, 1, 0], [], []>} : vector<8x256xf32>, vector<128x256xf32>, vector<8x128xf32> -> vector<8x128xf32>
    %7 = arith.addf %3, %6 : vector<8x128xf32>
    %c0_6 = arith.constant 0 : index
    %c0_7 = arith.constant 0 : index
    %8 = vector.load %arg8[%c0_6, %c0_7] : memref<8x128xf32, #tpu.memory_space<vmem>>, vector<8x128xf32>
    tpu.vector_store %arg8[%c0_6, %c0_7], %7 {strides = array<i32>} : memref<8x128xf32, #tpu.memory_space<vmem>>, vector<8x128xf32>,
    %c0_i32_8 = arith.constant 0 : i32
    %9 = arith.cmpi eq, %arg2, %c0_i32_8 : i32
    %10 = arith.extui %9 : i1 to i32
    %c0_i32_9 = arith.constant 0 : i32
    %11 = arith.cmpi ne, %10, %c0_i32_9 : i32
    scf.if %11 {
      %c0_10 = arith.constant 0 : index
      %c0_11 = arith.constant 0 : index
      %12 = vector.load %arg6[%c0_10, %c0_11] : memref<8x1xf32, #tpu.memory_space<vmem>>, vector<8x1xf32>
      %c0_12 = arith.constant 0 : index
      %c0_13 = arith.constant 0 : index
      %13 = vector.load %arg7[%c0_12, %c0_13] : memref<1x128xf32, #tpu.memory_space<vmem>>, vector<1x128xf32>
      %14 = vector.broadcast %12 : vector<8x1xf32> to vector<8x128xf32>
      %15 = vector.broadcast %13 : vector<1x128xf32> to vector<8x128xf32>
      %16 = arith.addf %14, %15 : vector<8x128xf32>
      %c0_14 = arith.constant 0 : index
      %c0_15 = arith.constant 0 : index
      %17 = vector.load %arg8[%c0_14, %c0_15] : memref<8x128xf32, #tpu.memory_space<vmem>>, vector<8x128xf32>
      %cst_16 = arith.constant 2.000000e+00 : f32
      %18 = vector.broadcast %cst_16 : f32 to vector<8x128xf32>
      %19 = arith.mulf %18, %17 : vector<8x128xf32>
      %20 = arith.subf %16, %19 : vector<8x128xf32>
      %c0_17 = arith.constant 0 : index
      %c0_18 = arith.constant 0 : index
      %21 = vector.load %arg8[%c0_17, %c0_18] : memref<8x128xf32, #tpu.memory_space<vmem>>, vector<8x128xf32>
      tpu.vector_store %arg8[%c0_17, %c0_18], %20 {strides = array<i32>} : memref<8x128xf32, #tpu.memory_space<vmem>>, vector<8x128xf32>,
    } else {
    }
    return
  }
  func.func @transform_0(%arg0: i32, %arg1: i32, %arg2: i32) -> i32 {
    %c0_i32 = arith.constant 0 : i32
    %c0_i32_0 = arith.constant 0 : i32
    return %c0_i32 : i32
  }
  func.func @transform_1(%arg0: i32, %arg1: i32, %arg2: i32) -> (i32, i32) {
    %c0_i32 = arith.constant 0 : i32
    return %arg0, %arg2 : i32, i32
  }
  func.func @transform_2(%arg0: i32, %arg1: i32, %arg2: i32) -> (i32, i32) {
    %c0_i32 = arith.constant 0 : i32
    return %arg1, %arg2 : i32, i32
  }
  func.func @transform_3(%arg0: i32, %arg1: i32, %arg2: i32) -> (i32, i32) {
    %c0_i32 = arith.constant 0 : i32
    %c0_i32_0 = arith.constant 0 : i32
    return %arg0, %c0_i32 : i32, i32
  }
  func.func @transform_4(%arg0: i32, %arg1: i32, %arg2: i32) -> (i32, i32) {
    %c0_i32 = arith.constant 0 : i32
    %c0_i32_0 = arith.constant 0 : i32
    return %c0_i32, %arg1 : i32, i32
  }
  func.func @transform_5(%arg0: i32, %arg1: i32, %arg2: i32) -> (i32, i32) {
    %c0_i32 = arith.constant 0 : i32
    return %arg0, %arg1 : i32, i32
  }
}

module attributes {stable_mosaic.version = 11 : i64} {
  func.func @_rbf_exp_kernel(%arg0: i32, %arg1: memref<8x128xf32, #tpu.memory_space<vmem>>, %arg2: memref<1xf32, #tpu.memory_space<smem>>, %arg3: memref<8x128xf32, #tpu.memory_space<vmem>>) attributes {dimension_semantics = [#tpu.dimension_semantics<parallel>], iteration_bounds = array<i64: 1>, scalar_prefetch = 0 : i64, scratch_operands = 0 : i64, tpu.core_type = #tpu.core_type<tc>, window_params = [{transform_indices = @transform_0, window_bounds = array<i64: 8, 128>}, {transform_indices = @transform_1, window_bounds = array<i64: 1>}, {transform_indices = @transform_2, window_bounds = array<i64: 8, 128>}]} {
    %c0 = arith.constant 0 : index
    %0 = memref.load %arg2[%c0] : memref<1xf32, #tpu.memory_space<smem>>
    %cst = arith.constant 0.000000e+00 : f32
    %1 = arith.subf %cst, %0 : f32
    %c0_0 = arith.constant 0 : index
    %c0_1 = arith.constant 0 : index
    %2 = vector.load %arg1[%c0_0, %c0_1] : memref<8x128xf32, #tpu.memory_space<vmem>>, vector<8x128xf32>
    %3 = vector.broadcast %1 : f32 to vector<8x128xf32>
    %4 = arith.mulf %3, %2 : vector<8x128xf32>
    %5 = math.exp %4 : vector<8x128xf32>
    %c0_2 = arith.constant 0 : index
    %c0_3 = arith.constant 0 : index
    %6 = vector.load %arg3[%c0_2, %c0_3] : memref<8x128xf32, #tpu.memory_space<vmem>>, vector<8x128xf32>
    tpu.vector_store %arg3[%c0_2, %c0_3], %5 {strides = array<i32>} : memref<8x128xf32, #tpu.memory_space<vmem>>, vector<8x128xf32>,
    return
  }
  func.func @transform_0(%arg0: i32) -> (i32, i32) {
    %c0_i32 = arith.constant 0 : i32
    %c0_i32_0 = arith.constant 0 : i32
    return %arg0, %c0_i32 : i32, i32
  }
  func.func @transform_1(%arg0: i32) -> i32 {
    %c0_i32 = arith.constant 0 : i32
    %c0_i32_0 = arith.constant 0 : i32
    return %c0_i32 : i32
  }
  func.func @transform_2(%arg0: i32) -> (i32, i32) {
    %c0_i32 = arith.constant 0 : i32
    %c0_i32_0 = arith.constant 0 : i32
    return %arg0, %c0_i32 : i32, i32
  }
}

</mosaic_0001>

<bundles_post_ra>
// kernel: _rbf_median_jit.3
= control target key start
LH: loop header
LB: loop body
LE: loop exit
PB: predicated region body
PF: predicated region fallthrough
CT: control target
= control target key end

     0   :  { %s50_s0 = inlined_call_operand.vmem [shape: f32[8,128], index: 0, kind: input, shape index: {}, may-alias: {0,2}]   ;;  %s51_s1 = inlined_call_operand.<no memory space> [shape: f32[1], index: 1, kind: input, shape index: {}]   ;;  %s52_s2 = inlined_call_operand.vmem [shape: f32[8,128], index: 2, kind: output, shape index: {}, may-alias: {0,2}]  }
   0x1   :  { %s13_s11 = ssub.f32 0.0, %s51_s1  ;;  %v14_v0 = vld [vmem:[%s50_s0] sm:$0xff] }
   0x3   :  { %v15_v1 = vstv %s13_s11 }
   0x4   :  { %v16_v2 = vmul.f32 %v15_v1, %v14_v0 }
   0x6   :  { %v17_v3 = vmul.f32 1.442695, %v16_v2 }
   0x8   :  { %24 = vpow2.f32 %v17_v3 }
  0x12   :  { %v25_v4 = vpop.eup %24 }
  0x13   :  { %19 = vst [vmem:[%s52_s2] sm:$0xff] %v25_v4 }

// kernel: _rbf_median_jit.2
= control target key start
LH: loop header
LB: loop body
LE: loop exit
PB: predicated region body
PF: predicated region fallthrough
CT: control target
= control target key end

     0   :  { %v194_v3 = vmov 0   ;;  %s336_s0 = inlined_call_operand.<no memory space> [shape: f32[1], index: 0, kind: input, shape index: {}]   ;;  %s337_s2 = inlined_call_operand.vmem [shape: f32[128,256], index: 2, kind: input, shape index: {}]   ;;  %s338_s1 = inlined_call_operand.vmem [shape: f32[8,256], index: 1, kind: input, shape index: {}]   ;;  %s339_s3 = inlined_call_operand.vmem [shape: f32[8,1], index: 3, kind: input, shape index: {}]   ;;  %s340_s4 = inlined_call_operand.vmem [shape: f32[1,128], index: 4, kind: input, shape index: {}]   ;;  %s341_s5 = inlined_call_operand.vmem [shape: f32[8,128], index: 5, kind: output, shape index: {}]  }
   0x1   :  { %v30_v0 = vld [vmem:[%s337_s2 + $0x8] sm:$0xff]  ;;  %v32_v1 = vld [vmem:[%s337_s2 + $0x18] sm:$0xff]  ;;  %v29_v2 = vld [vmem:[%s337_s2] sm:$0xff]  ;;  %193 = vset.pattern.permute.xlu0 %v194_v3 }
   0x2   :  { %v159_v4 = vpack.c.bf16 %v32_v1, %v30_v0  ;;  %v31_v5 = vld [vmem:[%s337_s2 + $0x10] sm:$0xff]  ;;  %v34_v6 = vld [vmem:[%s337_s2 + $0x28] sm:$0xff]  ;;  %v36_v7 = vld [vmem:[%s337_s2 + $0x38] sm:$0xff] }
   0x3   :  { %v161_v8 = vpack.c.bf16 %v31_v5, %v29_v2  ;;  %v163_v9 = vpack.c.bf16 %v36_v7, %v34_v6  ;;  %v33_v10 = vld [vmem:[%s337_s2 + $0x20] sm:$0xff]  ;;  %v35_v11 = vld [vmem:[%s337_s2 + $0x30] sm:$0xff]  ;;  %v38_v12 = vld [vmem:[%s337_s2 + $0x48] sm:$0xff] }
   0x4   :  { %160 = vmatprep.subr.bf16.mxu0 %v159_v4  ;;  %v40_v13 = vld [vmem:[%s337_s2 + $0x58] sm:$0xff]  ;;  %v165_v14 = vpack.c.bf16 %v35_v11, %v33_v10  ;;  %v28_v16 = vld [vmem:[%s338_s1 + $0x8] sm:$0xff]  ;;  %v136_v17 = vld [vmem:[%s339_s3] sm:$0xff] }
   0x5   :  { %162 = vmatpush1.bf16.xpose.msra.mxu0 %v161_v8  ;;  %v167_v15 = vpack.c.bf16 %v40_v13, %v38_v12  ;;  %125 = vmatprep.mubr.f32.mxu0 %v28_v16  ;;  %v37_v18 = vld [vmem:[%s337_s2 + $0x40] sm:$0xff]  ;;  %v39_v19 = vld [vmem:[%s337_s2 + $0x50] sm:$0xff]  ;;  %v42_v20 = vld [vmem:[%s337_s2 + $0x68] sm:$0xff] }
   0x6   :  { %164 = vmatprep.subr.bf16.mxu0 %v163_v9  ;;  %140 = vperm.xlu0 %193, %v136_v17   ;;  %v44_v21 = vld [vmem:[%s337_s2 + $0x78] sm:$0xff]  ;;  %v169_v22 = vpack.c.bf16 %v39_v19, %v37_v18  ;;  %v41_v24 = vld [vmem:[%s337_s2 + $0x60] sm:$0xff]  ;;  %v43_v25 = vld [vmem:[%s337_s2 + $0x70] sm:$0xff] }
   0x7   :  { %v171_v23 = vpack.c.bf16 %v44_v21, %v42_v20  ;;  %v46_v26 = vld [vmem:[%s337_s2 + $0x88] sm:$0xff]  ;;  %v48_v27 = vld [vmem:[%s337_s2 + $0x98] sm:$0xff]  ;;  %v173_v28 = vpack.c.bf16 %v43_v25, %v41_v24  ;;  %v45_v30 = vld [vmem:[%s337_s2 + $0x80] sm:$0xff] }
   0x8   :  { %v175_v29 = vpack.c.bf16 %v48_v27, %v46_v26  ;;  %v47_v31 = vld [vmem:[%s337_s2 + $0x90] sm:$0xff]  ;;  %v50_v32 = vld [vmem:[%s337_s2 + $0xa8] sm:$0xff]  ;;  %v52_v33 = vld [vmem:[%s337_s2 + $0xb8] sm:$0xff] }
   0x9   :  { %v177_v34 = vpack.c.bf16 %v47_v31, %v45_v30  ;;  %v179_v35 = vpack.c.bf16 %v52_v33, %v50_v32  ;;  %v49_v36 = vld [vmem:[%s337_s2 + $0xa0] sm:$0xff]  ;;  %v51_v37 = vld [vmem:[%s337_s2 + $0xb0] sm:$0xff]  ;;  %v54_v38 = vld [vmem:[%s337_s2 + $0xc8] sm:$0xff] }
   0xa   :  { %v56_v39 = vld [vmem:[%s337_s2 + $0xd8] sm:$0xff]  ;;  %v181_v40 = vpack.c.bf16 %v51_v37, %v49_v36  ;;  %v53_v42 = vld [vmem:[%s337_s2 + $0xc0] sm:$0xff]  ;;  %v55_v43 = vld [vmem:[%s337_s2 + $0xd0] sm:$0xff] }
   0xb   :  { %v183_v41 = vpack.c.bf16 %v56_v39, %v54_v38  ;;  %v58_v44 = vld [vmem:[%s337_s2 + $0xe8] sm:$0xff]  ;;  %v60_v45 = vld [vmem:[%s337_s2 + $0xf8] sm:$0xff]  ;;  %v185_v46 = vpack.c.bf16 %v55_v43, %v53_v42  ;;  %v57_v48 = vld [vmem:[%s337_s2 + $0xe0] sm:$0xff] }
   0xc   :  { %v187_v47 = vpack.c.bf16 %v60_v45, %v58_v44  ;;  %v59_v49 = vld [vmem:[%s337_s2 + $0xf0] sm:$0xff]  ;;  %v27_v51 = vld [vmem:[%s338_s1] sm:$0xff] }
   0xd   :  { %166 = vmatpush1.bf16.xpose.msra.mxu0 %v165_v14  ;;  %v189_v50 = vpack.c.bf16 %v59_v49, %v57_v48  ;;  %v158_v52 = vld [vmem:[%s340_s4] ss:$0 sm:$0xff] }
   0xe   :  { %168 = vmatprep.subr.bf16.mxu0 %v167_v15 }
  0x15   :  { %170 = vmatpush1.bf16.xpose.msra.mxu0 %v169_v22 }
  0x16   :  { %172 = vmatprep.subr.bf16.mxu0 %v171_v23 }
  0x1d   :  { %174 = vmatpush1.bf16.xpose.msra.mxu0 %v173_v28 }
  0x1e   :  { %176 = vmatprep.subr.bf16.mxu0 %v175_v29 }
  0x25   :  { %178 = vmatpush1.bf16.xpose.msra.mxu0 %v177_v34 }
  0x26   :  { %180 = vmatprep.subr.bf16.mxu0 %v179_v35 }
  0x2d   :  { %182 = vmatpush1.bf16.xpose.msra.mxu0 %v181_v40 }
  0x2e   :  { %184 = vmatprep.subr.bf16.mxu0 %v183_v41 }
  0x35   :  { %186 = vmatpush1.bf16.xpose.msra.mxu0 %v185_v46 }
  0x36   :  { %188 = vmatprep.subr.bf16.mxu0 %v187_v47 }
  0x3d   :  { %190 = vmatpush1.bf16.xpose.msra.mxu0 %v189_v50 }
  0x44   :  { %126 = vmatmul.mubr.f32.vlgmr.msra.gmra.mrb[0].mxu0 %v27_v51 }
  0x85   :  { %v141_v53 = vpop.permute.xlu0 %140 }
  0x86   :  { %v149_v56 = vadd.f32 %v158_v52, %v141_v53 }
 0x117   :  { %v127_v54 = vpop.f32.mrb[0].mxu0 }
 0x118   :  { %v129_v55 = vpop.f32.mrb[1].mxu0  ;;  %v151_v57 = vmul.f32 2.0, %v127_v54 }
 0x11a   :  { %v152_v58 = vsub.f32 %v149_v56, %v151_v57 }
 0x11c   :  { %153 = vst [vmem:[%s341_s5] sm:$0xff] %v152_v58 }

</bundles_post_ra>
